<compile_context>
chip_gen: v6e
topology: v6e:2x2x1
jax: 0.10.0
libtpu: 0.0.40
codegen_flags: <defaults>
</compile_context>

<pallas_src>
import math
import functools

import jax
import jax.numpy as jnp
from jax import lax
from jax.experimental import pallas as pl
from jax.experimental.pallas import tpu as pltpu


def _round_up(x, m):
    return (x + m - 1) // m * m


def _vmem_limit_bytes():
    """~7/8 of physical VMEM (~112 MiB on v5e/v6e, ~56 MiB on v7x)."""
    try:
        cap = int(pltpu.get_tpu_info().vmem_capacity_bytes)
    except Exception:
        cap = 64 * 1024 * 1024
    return cap * 7 // 8


# --------------------------------------------------------------------------
# Kernel A: fused QKV projection (one (H, 3H) bf16 matmul, f32 accumulation),
# head-major bf16 outputs written directly (no wrapper transpose afterwards).
# --------------------------------------------------------------------------
def _qkv_proj_kernel(x_ref, w_ref, b_ref, q_ref, k_ref, v_ref, *,
                     hidden, num_heads, head_dim, scale):
    x = x_ref[...]                                                  # bf16 (tr, H)
    qkv = jnp.dot(x, w_ref[...], preferred_element_type=jnp.float32) + b_ref[...]
    q = qkv[:, :hidden] * scale              # fold 1/sqrt(hd) into q (f32)
    k = qkv[:, hidden:2 * hidden]
    v = qkv[:, 2 * hidden:]
    # Head-major stores via static per-head lane slices: avoids any in-kernel
    # reshape/transpose and the inter-kernel XLA transpose over HBM.
    for h in range(num_heads):
        sl = slice(h * head_dim, (h + 1) * head_dim)
        q_ref[h] = q[:, sl].astype(jnp.bfloat16)
        k_ref[h] = k[:, sl].astype(jnp.bfloat16)
        v_ref[h] = v[:, sl].astype(jnp.bfloat16)


# --------------------------------------------------------------------------
# Kernel B: flash-style causal varlen attention + fused output projection.
#   Heads are a leading batch dim of one dot_general. Tile classification
#   (skip / interior / boundary) is done on the scalar unit from SMEM segment
#   ids; the finite -1e30 additive mask keeps fully-masked rows NaN-free (they
#   are corrected by alpha once a valid tile arrives — every non-padded row
#   attends at least to itself, and the diagonal tile is never skipped).
# --------------------------------------------------------------------------
def _flash_attn_kernel(seg_smem, q_ref, k_ref, v_ref, wo_ref, bo_ref,
                       segq_ref, segk_ref, o_ref, m_sc, l_sc, acc_sc,
                       *, block_q, block_k):
    qi = pl.program_id(0)
    ki = pl.program_id(1)

    q_first = qi * block_q
    q_last = q_first + (block_q - 1)
    k_first = ki * block_k
    k_last = k_first + (block_k - 1)

    # scalar tile classification from SMEM per-token segment ids (monotone)
    seg_q_first = seg_smem[q_first]
    seg_q_last = seg_smem[q_last]
    seg_k_first = seg_smem[k_first]
    seg_k_last = seg_smem[k_last]

    # run == False  -> tile fully masked (above causal diagonal, or k entirely
    #                  in an earlier segment): skip all MXU/softmax work.
    run = (k_first <= q_last) & (seg_k_last >= seg_q_first)
    # interior == True -> every (q, k) pair valid: no mask needed at all.
    interior = ((k_last <= q_first)
                & (seg_q_first == seg_q_last)
                & (seg_k_first == seg_k_last)
                & (seg_q_first == seg_k_first))

    @pl.when(ki == 0)
    def _init():
        m_sc[...] = jnp.full(m_sc.shape, -jnp.inf, dtype=jnp.float32)
        l_sc[...] = jnp.zeros(l_sc.shape, jnp.float32)
        acc_sc[...] = jnp.zeros(acc_sc.shape, jnp.float32)

    def _scores():
        # all heads at once: (nh, tq, tk), f32 accumulation on the MXU
        return lax.dot_general(q_ref[...], k_ref[...],
                               dimension_numbers=(((2,), (2,)), ((0,), (0,))),
                               preferred_element_type=jnp.float32)

    def _update(s):
        # online softmax (f32 elementwise math)
        m_prev = m_sc[...]
        m_new = jnp.maximum(m_prev, s.max(axis=-1, keepdims=True))
        alpha = jnp.exp(m_prev - m_new)
        p = jnp.exp(s - m_new)
        # TODO(synk): fold the denominator into an MXU dot against a ones column
        # to take this lane reduction off the XLU if it shows up in profiles.
        l_sc[...] = alpha * l_sc[...] + p.sum(axis=-1, keepdims=True)
        acc_sc[...] = alpha * acc_sc[...] + lax.dot_general(
            p.astype(jnp.bfloat16), v_ref[...],
            dimension_numbers=(((2,), (1,)), ((0,), (0,))),
            preferred_element_type=jnp.float32)                     # (nh, tq, hd)
        m_sc[...] = m_new

    @pl.when(run & interior)
    def _interior_tile():                 # fully valid: no mask build / add
        _update(_scores())

    @pl.when(run & jnp.logical_not(interior))
    def _boundary_tile():                 # diagonal / segment-boundary tiles
        s = _scores()
        q_pos = q_first + lax.broadcasted_iota(jnp.int32, (block_q, 1), 0)
        k_pos = k_first + lax.broadcasted_iota(jnp.int32, (1, block_k), 1)
        seg_q = segq_ref[...]                                       # (tq, 1)
        k_start = pl.multiple_of(k_first, block_k)
        seg_k = segk_ref[:, pl.ds(k_start, block_k)]                # (1, tk)
        valid = (k_pos <= q_pos) & (seg_q == seg_k)
        s = s + jnp.where(valid, 0.0, -1e30).astype(jnp.float32)    # finite mask
        _update(s)

    @pl.when(ki == pl.num_programs(1) - 1)
    def _epilogue():
        # normalize after PV (touches tq*hd, not tq*tk) with the EUP reciprocal
        attn = acc_sc[...] * pl.reciprocal(l_sc[...], approx=True)
        # fused output projection via per-head Wo slabs, accumulated over heads
        proj = lax.dot_general(attn.astype(jnp.bfloat16), wo_ref[...],
                               dimension_numbers=(((2,), (1,)), ((0,), (0,))),
                               preferred_element_type=jnp.float32)  # (nh, tq, H)
        o_ref[...] = (jnp.sum(proj, axis=0) + bo_ref[...]).astype(o_ref.dtype)


# --------------------------------------------------------------------------
# Wrapper
# --------------------------------------------------------------------------
def flash_causal_attention_block(x, cu_seqlens, max_seqlen, params, *,
                                 num_heads, block_q=256, block_k=256,
                                 block_rows=512):
    del max_seqlen  # only a scheduling hint for flash-attn; not needed here
    T, H = x.shape
    assert H % num_heads == 0
    hd = H // num_heads
    wq, bq, wk, bk, wv, bv, wo, bo = params

    # ---- host-side layout plumbing (one-off, free) ----
    # fused QKV weight so Kernel A is a single wide weight-stationary matmul
    # TODO(synk): for large H (>= ~2048) tile the 3H axis of w_qkv with a second
    # grid dimension so the fused weight need not be fully VMEM-resident.
    w_qkv = jnp.concatenate([wq.T, wk.T, wv.T], axis=1).astype(jnp.bfloat16)
    b_qkv = jnp.concatenate([bq, bk, bv]).reshape(1, 3 * H).astype(jnp.float32)
    # TODO(synk): on v7x (64 MiB VMEM) with large H, split the output projection
    # into its own kernel tiled over H instead of keeping the full Wo slab resident.
    wo_heads = wo.T.reshape(num_heads, hd, H).astype(jnp.bfloat16)
    bo2 = bo.reshape(1, H).astype(jnp.float32)

    # sequence tiling (multiples of 8; clamp to the padded total length)
    t8 = _round_up(T, 8)
    blk_q = max(8, min(_round_up(block_q, 8), t8))
    blk_k = max(8, min(_round_up(block_k, 8), t8))
    blk_r = max(8, min(_round_up(block_rows, 8), t8))   # Kernel-A row tile
    T_pad = _round_up(T, math.lcm(blk_q, blk_k, blk_r))
    if T_pad != T:
        x = jnp.pad(x, ((0, T_pad - T), (0, 0)))        # padded tokens -> own seg
    x = x.astype(jnp.bfloat16)                           # halves Kernel-A input DMA

    # per-token segment id (padded tokens get id == num_seqs); replaces the
    # O(num_seqs) unrolled compare loop inside the kernel.
    pos = jnp.arange(T_pad, dtype=jnp.int32)
    seg = jnp.sum(pos[:, None] >= cu_seqlens[None, 1:].astype(jnp.int32),
                  axis=1).astype(jnp.int32)              # (T_pad,)
    seg_col = seg.reshape(T_pad, 1)                      # q-side (sublane) view
    seg_row = seg.reshape(1, T_pad)                      # k-side (lane) view

    vmem_limit = _vmem_limit_bytes()
    const = pl.Buffered(1)   # single-buffer operands whose block index is constant

    # ---- Kernel A: fused QKV projection, head-major outputs ----
    q_h, k_h, v_h = pl.pallas_call(
        functools.partial(_qkv_proj_kernel, hidden=H, num_heads=num_heads,
                          head_dim=hd, scale=1.0 / math.sqrt(hd)),
        out_shape=[jax.ShapeDtypeStruct((num_heads, T_pad, hd), jnp.bfloat16)] * 3,
        grid_spec=pltpu.PrefetchScalarGridSpec(
            num_scalar_prefetch=0,
            grid=(T_pad // blk_r,),
            in_specs=[
                pl.BlockSpec((blk_r, H), lambda r: (r, 0)),
                pl.BlockSpec((H, 3 * H), lambda r: (0, 0), pipeline_mode=const),
                pl.BlockSpec((1, 3 * H), lambda r: (0, 0), pipeline_mode=const),
            ],
            out_specs=[pl.BlockSpec((num_heads, blk_r, hd), lambda r: (0, r, 0))] * 3,
        ),
        compiler_params=pltpu.CompilerParams(
            dimension_semantics=("parallel",),
            vmem_limit_bytes=vmem_limit),
    )(x, w_qkv, b_qkv)

    # ---- Kernel B: flash attention + fused output projection ----
    grid = (T_pad // blk_q, T_pad // blk_k)
    out = pl.pallas_call(
        functools.partial(_flash_attn_kernel, block_q=blk_q, block_k=blk_k),
        out_shape=jax.ShapeDtypeStruct((T_pad, H), jnp.float32),
        grid_spec=pltpu.PrefetchScalarGridSpec(
            num_scalar_prefetch=1,            # per-token segment ids -> SMEM
            grid=grid,
            in_specs=[
                # q changes only with qi (could also be Buffered(1)); k/v stay
                # default double-buffered so their DMA overlaps compute.
                pl.BlockSpec((num_heads, blk_q, hd), lambda qi, ki, seg: (0, qi, 0)),
                pl.BlockSpec((num_heads, blk_k, hd), lambda qi, ki, seg: (0, ki, 0)),
                pl.BlockSpec((num_heads, blk_k, hd), lambda qi, ki, seg: (0, ki, 0)),
                pl.BlockSpec((num_heads, hd, H), lambda qi, ki, seg: (0, 0, 0),
                             pipeline_mode=const),
                pl.BlockSpec((1, H), lambda qi, ki, seg: (0, 0),
                             pipeline_mode=const),
                pl.BlockSpec((blk_q, 1), lambda qi, ki, seg: (qi, 0)),
                pl.BlockSpec((1, T_pad), lambda qi, ki, seg: (0, 0),
                             pipeline_mode=const),
            ],
            out_specs=pl.BlockSpec((blk_q, H), lambda qi, ki, seg: (qi, 0)),
            scratch_shapes=[
                pltpu.VMEM((num_heads, blk_q, 1), jnp.float32),   # running max
                pltpu.VMEM((num_heads, blk_q, 1), jnp.float32),   # running denom
                pltpu.VMEM((num_heads, blk_q, hd), jnp.float32),  # accumulator
            ],
        ),
        compiler_params=pltpu.CompilerParams(
            dimension_semantics=("parallel", "arbitrary"),
            vmem_limit_bytes=vmem_limit),
    )(seg, q_h, k_h, v_h, wo_heads, bo2, seg_col, seg_row)

    return out[:T]


# --------------------------------------------------------------------------
# Pure-JAX reference (PyTorch module semantics); emulate_kernel_dtypes=True
# replays the kernel's bf16-input / f32-accumulate numerics for a tight check.
# --------------------------------------------------------------------------
def _reference(x, cu_seqlens, params, *, num_heads, emulate_kernel_dtypes):
    T, H = x.shape
    hd = H // num_heads
    wq, bq, wk, bk, wv, bv, wo, bo = params
    cast = (lambda a: a.astype(jnp.bfloat16)) if emulate_kernel_dtypes else (lambda a: a)

    def lin(inp, w, b):
        return jnp.dot(cast(inp), cast(w.T), preferred_element_type=jnp.float32) + b

    q = lin(x, wq, bq) * (1.0 / math.sqrt(hd))
    k = lin(x, wk, bk)
    v = lin(x, wv, bv)
    q, k, v = cast(q), cast(k), cast(v)
    qh = q.reshape(T, num_heads, hd).transpose(1, 0, 2)
    kh = k.reshape(T, num_heads, hd).transpose(1, 0, 2)
    vh = v.reshape(T, num_heads, hd).transpose(1, 0, 2)

    s = jnp.einsum("hqd,hkd->hqk", qh, kh, preferred_element_type=jnp.float32)
    pos = jnp.arange(T)
    seg = jnp.sum(pos[:, None] >= cu_seqlens[None, 1:], axis=1)
    valid = (pos[:, None] >= pos[None, :]) & (seg[:, None] == seg[None, :])
    s = s + jnp.where(valid, 0.0, -1e30).astype(jnp.float32)

    m = s.max(axis=-1, keepdims=True)
    p = jnp.exp(s - m)
    denom = p.sum(axis=-1, keepdims=True)
    o = jnp.einsum("hqk,hkd->hqd", cast(p), vh,
                   preferred_element_type=jnp.float32) / denom
    proj = jnp.einsum("hqd,hdo->qo", cast(o),
                      cast(wo.T.reshape(num_heads, hd, H)),
                      preferred_element_type=jnp.float32)
    return proj + bo


if __name__ == "__main__":
    hidden_dim, num_heads = 32, 4
    # 3 packed sequences; total 37 -> padded to 40 inside. With 8x8 tiles this
    # gives a 5x5 grid that exercises the skipped, interior and boundary tile
    # paths of Kernel B.
    seq_lens = [6, 7, 24]
    total_len = sum(seq_lens)
    cu = [0]
    for L in seq_lens:
        cu.append(cu[-1] + L)
    cu_seqlens = jnp.array(cu, dtype=jnp.int32)
    max_seqlen = max(seq_lens)

    key = jax.random.PRNGKey(0)
    ks = jax.random.split(key, 9)
    init_scale = 1.0 / math.sqrt(hidden_dim)

    def init_linear(kw, kb):
        w = jax.random.uniform(kw, (hidden_dim, hidden_dim), jnp.float32,
                               -init_scale, init_scale)
        b = jax.random.uniform(kb, (hidden_dim,), jnp.float32,
                               -init_scale, init_scale)
        return w, b

    wq, bq = init_linear(ks[0], ks[1])
    wk, bk = init_linear(ks[2], ks[3])
    wv, bv = init_linear(ks[4], ks[5])
    wo, bo = init_linear(ks[6], ks[7])
    params = (wq, bq, wk, bk, wv, bv, wo, bo)

    x = jax.random.normal(ks[8], (total_len, hidden_dim), jnp.float32)

    out = flash_causal_attention_block(x, cu_seqlens, max_seqlen, params,
                                       num_heads=num_heads,
                                       block_q=8, block_k=8)
    out = jax.block_until_ready(out)
    assert out.shape == (total_len, hidden_dim)

    ref_emul = _reference(x, cu_seqlens, params, num_heads=num_heads,
                          emulate_kernel_dtypes=True)
    ref_f32 = _reference(x, cu_seqlens, params, num_heads=num_heads,
                         emulate_kernel_dtypes=False)
    assert jnp.allclose(out, ref_emul, atol=1e-2, rtol=1e-2), "mismatch vs bf16 reference"
    assert jnp.allclose(out, ref_f32, atol=5e-2, rtol=5e-2), "mismatch vs f32 reference"

    print("KERNEL_OK")
</pallas_src>

<mosaic_0001>
module attributes {stable_mosaic.version = 11 : i64} {
  func.func @_qkv_proj_kernel(%arg0: i32, %arg1: memref<40x32xbf16, #tpu.memory_space<vmem>>, %arg2: memref<32x96xbf16, #tpu.memory_space<vmem>>, %arg3: memref<1x96xf32, #tpu.memory_space<vmem>>, %arg4: memref<4x40x8xbf16, #tpu.memory_space<vmem>>, %arg5: memref<4x40x8xbf16, #tpu.memory_space<vmem>>, %arg6: memref<4x40x8xbf16, #tpu.memory_space<vmem>>) attributes {dimension_semantics = [#tpu.dimension_semantics<parallel>], iteration_bounds = array<i64: 1>, scalar_prefetch = 0 : i64, scratch_operands = 0 : i64, tpu.core_type = #tpu.core_type<tc>, window_params = [{transform_indices = @transform_0, window_bounds = array<i64: 40, 32>}, {pipeline_mode = #tpu.pipeline_mode<synchronous>, transform_indices = @transform_1, window_bounds = array<i64: 32, 96>}, {pipeline_mode = #tpu.pipeline_mode<synchronous>, transform_indices = @transform_2, window_bounds = array<i64: 1, 96>}, {transform_indices = @transform_3, window_bounds = array<i64: 4, 40, 8>}, {transform_indices = @transform_4, window_bounds = array<i64: 4, 40, 8>}, {transform_indices = @transform_5, window_bounds = array<i64: 4, 40, 8>}]} {
    %c0 = arith.constant 0 : index
    %c0_0 = arith.constant 0 : index
    %0 = vector.load %arg1[%c0, %c0_0] : memref<40x32xbf16, #tpu.memory_space<vmem>>, vector<40x32xbf16>
    %c0_1 = arith.constant 0 : index
    %c0_2 = arith.constant 0 : index
    %1 = vector.load %arg2[%c0_1, %c0_2] : memref<32x96xbf16, #tpu.memory_space<vmem>>, vector<32x96xbf16>
    %cst = arith.constant dense<0.000000e+00> : vector<40x96xf32>
    %2 = tpu.matmul %0, %1, %cst {dimension_numbers = #tpu.dot_dimension_numbers<[1], [0], [0], [1], [0, 0, 1, 1], [], []>} : vector<40x32xbf16>, vector<32x96xbf16>, vector<40x96xf32> -> vector<40x96xf32>
    %c0_3 = arith.constant 0 : index
    %c0_4 = arith.constant 0 : index
    %3 = vector.load %arg3[%c0_3, %c0_4] : memref<1x96xf32, #tpu.memory_space<vmem>>, vector<1x96xf32>
    %4 = vector.broadcast %3 : vector<1x96xf32> to vector<40x96xf32>
    %5 = arith.addf %2, %4 : vector<40x96xf32>
    %6 = vector.extract_strided_slice %5 {offsets = [0, 0], sizes = [40, 32], strides = [1, 1]} : vector<40x96xf32> to vector<40x32xf32>
    %cst_5 = arith.constant 0.353553385 : f32
    %7 = vector.broadcast %cst_5 : f32 to vector<40x32xf32>
    %8 = arith.mulf %6, %7 : vector<40x32xf32>
    %9 = vector.extract_strided_slice %5 {offsets = [0, 32], sizes = [40, 32], strides = [1, 1]} : vector<40x96xf32> to vector<40x32xf32>
    %10 = vector.extract_strided_slice %5 {offsets = [0, 64], sizes = [40, 32], strides = [1, 1]} : vector<40x96xf32> to vector<40x32xf32>
    %11 = vector.extract_strided_slice %8 {offsets = [0, 0], sizes = [40, 8], strides = [1, 1]} : vector<40x32xf32> to vector<40x8xf32>
    %12 = arith.truncf %11 : vector<40x8xf32> to vector<40x8xbf16>
    %c0_6 = arith.constant 0 : index
    %c0_7 = arith.constant 0 : index
    %c0_8 = arith.constant 0 : index
    %13 = vector.load %arg4[%c0_6, %c0_7, %c0_8] : memref<4x40x8xbf16, #tpu.memory_space<vmem>>, vector<1x40x8xbf16>
    %14 = vector.shape_cast %13 : vector<1x40x8xbf16> to vector<40x8xbf16>
    %15 = vector.shape_cast %12 : vector<40x8xbf16> to vector<1x40x8xbf16>
    tpu.vector_store %arg4[%c0_6, %c0_7, %c0_8], %15 {strides = array<i32>} : memref<4x40x8xbf16, #tpu.memory_space<vmem>>, vector<1x40x8xbf16>,
    %16 = vector.extract_strided_slice %9 {offsets = [0, 0], sizes = [40, 8], strides = [1, 1]} : vector<40x32xf32> to vector<40x8xf32>
    %17 = arith.truncf %16 : vector<40x8xf32> to vector<40x8xbf16>
    %c0_9 = arith.constant 0 : index
    %c0_10 = arith.constant 0 : index
    %c0_11 = arith.constant 0 : index
    %18 = vector.load %arg5[%c0_9, %c0_10, %c0_11] : memref<4x40x8xbf16, #tpu.memory_space<vmem>>, vector<1x40x8xbf16>
    %19 = vector.shape_cast %18 : vector<1x40x8xbf16> to vector<40x8xbf16>
    %20 = vector.shape_cast %17 : vector<40x8xbf16> to vector<1x40x8xbf16>
    tpu.vector_store %arg5[%c0_9, %c0_10, %c0_11], %20 {strides = array<i32>} : memref<4x40x8xbf16, #tpu.memory_space<vmem>>, vector<1x40x8xbf16>,
    %21 = vector.extract_strided_slice %10 {offsets = [0, 0], sizes = [40, 8], strides = [1, 1]} : vector<40x32xf32> to vector<40x8xf32>
    %22 = arith.truncf %21 : vector<40x8xf32> to vector<40x8xbf16>
    %c0_12 = arith.constant 0 : index
    %c0_13 = arith.constant 0 : index
    %c0_14 = arith.constant 0 : index
    %23 = vector.load %arg6[%c0_12, %c0_13, %c0_14] : memref<4x40x8xbf16, #tpu.memory_space<vmem>>, vector<1x40x8xbf16>
    %24 = vector.shape_cast %23 : vector<1x40x8xbf16> to vector<40x8xbf16>
    %25 = vector.shape_cast %22 : vector<40x8xbf16> to vector<1x40x8xbf16>
    tpu.vector_store %arg6[%c0_12, %c0_13, %c0_14], %25 {strides = array<i32>} : memref<4x40x8xbf16, #tpu.memory_space<vmem>>, vector<1x40x8xbf16>,
    %26 = vector.extract_strided_slice %8 {offsets = [0, 8], sizes = [40, 8], strides = [1, 1]} : vector<40x32xf32> to vector<40x8xf32>
    %27 = arith.truncf %26 : vector<40x8xf32> to vector<40x8xbf16>
    %c1 = arith.constant 1 : index
    %c0_15 = arith.constant 0 : index
    %c0_16 = arith.constant 0 : index
    %28 = vector.load %arg4[%c1, %c0_15, %c0_16] : memref<4x40x8xbf16, #tpu.memory_space<vmem>>, vector<1x40x8xbf16>
    %29 = vector.shape_cast %28 : vector<1x40x8xbf16> to vector<40x8xbf16>
    %30 = vector.shape_cast %27 : vector<40x8xbf16> to vector<1x40x8xbf16>
    tpu.vector_store %arg4[%c1, %c0_15, %c0_16], %30 {strides = array<i32>} : memref<4x40x8xbf16, #tpu.memory_space<vmem>>, vector<1x40x8xbf16>,
    %31 = vector.extract_strided_slice %9 {offsets = [0, 8], sizes = [40, 8], strides = [1, 1]} : vector<40x32xf32> to vector<40x8xf32>
    %32 = arith.truncf %31 : vector<40x8xf32> to vector<40x8xbf16>
    %c1_17 = arith.constant 1 : index
    %c0_18 = arith.constant 0 : index
    %c0_19 = arith.constant 0 : index
    %33 = vector.load %arg5[%c1_17, %c0_18, %c0_19] : memref<4x40x8xbf16, #tpu.memory_space<vmem>>, vector<1x40x8xbf16>
    %34 = vector.shape_cast %33 : vector<1x40x8xbf16> to vector<40x8xbf16>
    %35 = vector.shape_cast %32 : vector<40x8xbf16> to vector<1x40x8xbf16>
    tpu.vector_store %arg5[%c1_17, %c0_18, %c0_19], %35 {strides = array<i32>} : memref<4x40x8xbf16, #tpu.memory_space<vmem>>, vector<1x40x8xbf16>,
    %36 = vector.extract_strided_slice %10 {offsets = [0, 8], sizes = [40, 8], strides = [1, 1]} : vector<40x32xf32> to vector<40x8xf32>
    %37 = arith.truncf %36 : vector<40x8xf32> to vector<40x8xbf16>
    %c1_20 = arith.constant 1 : index
    %c0_21 = arith.constant 0 : index
    %c0_22 = arith.constant 0 : index
    %38 = vector.load %arg6[%c1_20, %c0_21, %c0_22] : memref<4x40x8xbf16, #tpu.memory_space<vmem>>, vector<1x40x8xbf16>
    %39 = vector.shape_cast %38 : vector<1x40x8xbf16> to vector<40x8xbf16>
    %40 = vector.shape_cast %37 : vector<40x8xbf16> to vector<1x40x8xbf16>
    tpu.vector_store %arg6[%c1_20, %c0_21, %c0_22], %40 {strides = array<i32>} : memref<4x40x8xbf16, #tpu.memory_space<vmem>>, vector<1x40x8xbf16>,
    %41 = vector.extract_strided_slice %8 {offsets = [0, 16], sizes = [40, 8], strides = [1, 1]} : vector<40x32xf32> to vector<40x8xf32>
    %42 = arith.truncf %41 : vector<40x8xf32> to vector<40x8xbf16>
    %c2 = arith.constant 2 : index
    %c0_23 = arith.constant 0 : index
    %c0_24 = arith.constant 0 : index
    %43 = vector.load %arg4[%c2, %c0_23, %c0_24] : memref<4x40x8xbf16, #tpu.memory_space<vmem>>, vector<1x40x8xbf16>
    %44 = vector.shape_cast %43 : vector<1x40x8xbf16> to vector<40x8xbf16>
    %45 = vector.shape_cast %42 : vector<40x8xbf16> to vector<1x40x8xbf16>
    tpu.vector_store %arg4[%c2, %c0_23, %c0_24], %45 {strides = array<i32>} : memref<4x40x8xbf16, #tpu.memory_space<vmem>>, vector<1x40x8xbf16>,
    %46 = vector.extract_strided_slice %9 {offsets = [0, 16], sizes = [40, 8], strides = [1, 1]} : vector<40x32xf32> to vector<40x8xf32>
    %47 = arith.truncf %46 : vector<40x8xf32> to vector<40x8xbf16>
    %c2_25 = arith.constant 2 : index
    %c0_26 = arith.constant 0 : index
    %c0_27 = arith.constant 0 : index
    %48 = vector.load %arg5[%c2_25, %c0_26, %c0_27] : memref<4x40x8xbf16, #tpu.memory_space<vmem>>, vector<1x40x8xbf16>
    %49 = vector.shape_cast %48 : vector<1x40x8xbf16> to vector<40x8xbf16>
    %50 = vector.shape_cast %47 : vector<40x8xbf16> to vector<1x40x8xbf16>
    tpu.vector_store %arg5[%c2_25, %c0_26, %c0_27], %50 {strides = array<i32>} : memref<4x40x8xbf16, #tpu.memory_space<vmem>>, vector<1x40x8xbf16>,
    %51 = vector.extract_strided_slice %10 {offsets = [0, 16], sizes = [40, 8], strides = [1, 1]} : vector<40x32xf32> to vector<40x8xf32>
    %52 = arith.truncf %51 : vector<40x8xf32> to vector<40x8xbf16>
    %c2_28 = arith.constant 2 : index
    %c0_29 = arith.constant 0 : index
    %c0_30 = arith.constant 0 : index
    %53 = vector.load %arg6[%c2_28, %c0_29, %c0_30] : memref<4x40x8xbf16, #tpu.memory_space<vmem>>, vector<1x40x8xbf16>
    %54 = vector.shape_cast %53 : vector<1x40x8xbf16> to vector<40x8xbf16>
    %55 = vector.shape_cast %52 : vector<40x8xbf16> to vector<1x40x8xbf16>
    tpu.vector_store %arg6[%c2_28, %c0_29, %c0_30], %55 {strides = array<i32>} : memref<4x40x8xbf16, #tpu.memory_space<vmem>>, vector<1x40x8xbf16>,
    %56 = vector.extract_strided_slice %8 {offsets = [0, 24], sizes = [40, 8], strides = [1, 1]} : vector<40x32xf32> to vector<40x8xf32>
    %57 = arith.truncf %56 : vector<40x8xf32> to vector<40x8xbf16>
    %c3 = arith.constant 3 : index
    %c0_31 = arith.constant 0 : index
    %c0_32 = arith.constant 0 : index
    %58 = vector.load %arg4[%c3, %c0_31, %c0_32] : memref<4x40x8xbf16, #tpu.memory_space<vmem>>, vector<1x40x8xbf16>
    %59 = vector.shape_cast %58 : vector<1x40x8xbf16> to vector<40x8xbf16>
    %60 = vector.shape_cast %57 : vector<40x8xbf16> to vector<1x40x8xbf16>
    tpu.vector_store %arg4[%c3, %c0_31, %c0_32], %60 {strides = array<i32>} : memref<4x40x8xbf16, #tpu.memory_space<vmem>>, vector<1x40x8xbf16>,
    %61 = vector.extract_strided_slice %9 {offsets = [0, 24], sizes = [40, 8], strides = [1, 1]} : vector<40x32xf32> to vector<40x8xf32>
    %62 = arith.truncf %61 : vector<40x8xf32> to vector<40x8xbf16>
    %c3_33 = arith.constant 3 : index
    %c0_34 = arith.constant 0 : index
    %c0_35 = arith.constant 0 : index
    %63 = vector.load %arg5[%c3_33, %c0_34, %c0_35] : memref<4x40x8xbf16, #tpu.memory_space<vmem>>, vector<1x40x8xbf16>
    %64 = vector.shape_cast %63 : vector<1x40x8xbf16> to vector<40x8xbf16>
    %65 = vector.shape_cast %62 : vector<40x8xbf16> to vector<1x40x8xbf16>
    tpu.vector_store %arg5[%c3_33, %c0_34, %c0_35], %65 {strides = array<i32>} : memref<4x40x8xbf16, #tpu.memory_space<vmem>>, vector<1x40x8xbf16>,
    %66 = vector.extract_strided_slice %10 {offsets = [0, 24], sizes = [40, 8], strides = [1, 1]} : vector<40x32xf32> to vector<40x8xf32>
    %67 = arith.truncf %66 : vector<40x8xf32> to vector<40x8xbf16>
    %c3_36 = arith.constant 3 : index
    %c0_37 = arith.constant 0 : index
    %c0_38 = arith.constant 0 : index
    %68 = vector.load %arg6[%c3_36, %c0_37, %c0_38] : memref<4x40x8xbf16, #tpu.memory_space<vmem>>, vector<1x40x8xbf16>
    %69 = vector.shape_cast %68 : vector<1x40x8xbf16> to vector<40x8xbf16>
    %70 = vector.shape_cast %67 : vector<40x8xbf16> to vector<1x40x8xbf16>
    tpu.vector_store %arg6[%c3_36, %c0_37, %c0_38], %70 {strides = array<i32>} : memref<4x40x8xbf16, #tpu.memory_space<vmem>>, vector<1x40x8xbf16>,
    return
  }
  func.func @transform_0(%arg0: i32) -> (i32, i32) {
    %c0_i32 = arith.constant 0 : i32
    %c0_i32_0 = arith.constant 0 : i32
    return %arg0, %c0_i32 : i32, i32
  }
  func.func @transform_1(%arg0: i32) -> (i32, i32) {
    %c0_i32 = arith.constant 0 : i32
    %c0_i32_0 = arith.constant 0 : i32
    %c0_i32_1 = arith.constant 0 : i32
    return %c0_i32, %c0_i32_0 : i32, i32
  }
  func.func @transform_2(%arg0: i32) -> (i32, i32) {
    %c0_i32 = arith.constant 0 : i32
    %c0_i32_0 = arith.constant 0 : i32
    %c0_i32_1 = arith.constant 0 : i32
    return %c0_i32, %c0_i32_0 : i32, i32
  }
  func.func @transform_3(%arg0: i32) -> (i32, i32, i32) {
    %c0_i32 = arith.constant 0 : i32
    %c0_i32_0 = arith.constant 0 : i32
    %c0_i32_1 = arith.constant 0 : i32
    return %c0_i32, %arg0, %c0_i32_0 : i32, i32, i32
  }
  func.func @transform_4(%arg0: i32) -> (i32, i32, i32) {
    %c0_i32 = arith.constant 0 : i32
    %c0_i32_0 = arith.constant 0 : i32
    %c0_i32_1 = arith.constant 0 : i32
    return %c0_i32, %arg0, %c0_i32_0 : i32, i32, i32
  }
  func.func @transform_5(%arg0: i32) -> (i32, i32, i32) {
    %c0_i32 = arith.constant 0 : i32
    %c0_i32_0 = arith.constant 0 : i32
    %c0_i32_1 = arith.constant 0 : i32
    return %c0_i32, %arg0, %c0_i32_0 : i32, i32, i32
  }
}

</mosaic_0001>

<bundles_post_ra>
// kernel: tpu_custom_call.1
= control target key start
LH: loop header
LB: loop body
LE: loop exit
PB: predicated region body
PF: predicated region fallthrough
CT: control target
= control target key end

     0   :  { %v531_v0 = vmov 0.0   ;;  %vm532_vm0 = vmmov 0   ;;  %vm59_vm1 = vcmask 261120   ;;  %vm151_vm2 = vcmask 60416   ;;  %s534_s7 = smov 64   ;;  %s535_s8 = smov 56   ;;  %s896_s1 = inlined_call_operand.vmem [shape: bf16[32,96], index: 1, kind: input, shape index: {}]   ;;  %s897_s0 = inlined_call_operand.vmem [shape: bf16[40,32], index: 0, kind: input, shape index: {}]   ;;  %s898_s2 = inlined_call_operand.vmem [shape: f32[1,96], index: 2, kind: input, shape index: {}]   ;;  %s899_s3 = inlined_call_operand.vmem [shape: bf16[4,40,8], index: 3, kind: output, shape index: {0}]   ;;  %s900_s4 = inlined_call_operand.vmem [shape: bf16[4,40,8], index: 4, kind: output, shape index: {1}]   ;;  %s901_s5 = inlined_call_operand.vmem [shape: bf16[4,40,8], index: 5, kind: output, shape index: {2}]  }
   0x1   :  { %493 = vmatprep.subr.bf16.mxu0 %v531_v0  ;;  %509 = vmatprep.subr.bf16.mxu1 %v531_v0  ;;  %v526_v1 = vld [vmem:[%s896_s1 + $0x8] sm:$0xff]   ;;  %v527_v2 = vld [vmem:[%s896_s1] sm:$0xff]   ;;  %v530_v5 = vld [vmem:[%s897_s0 + $0x10] ss:$0 sps:$4 sm:$0xff]   ;;  %s536_s15 = smov 88   ;;  %s537_s16 = smov 80  }
   0x2   :  { %497 = vmatprep.mubr.msk.bf16.mxu0 %vm532_vm0, %v531_v0  ;;  %501 = vmatprep.mubr.msk.bf16.mxu1 %vm532_vm0, %v531_v0  ;;  %v528_v3 = vld [vmem:[%s897_s0] sm:$0xff]   ;;  %v529_v4 = vld [vmem:[%s897_s0 + $0x8] sm:$0xff]   ;;  %s533_s0 = smov 96   ;;  %s538_s17 = smov 48  }
   0x3   :  { %494 = vmatpush3.bf16.msra.mxu0 %v526_v1  ;;  %511 = vmatpush3.bf16.msra.mxu1 %v526_v1  ;;  %v414_v6 = vld [vmem:[%s898_s2] ss:$0 sm:$0xff]  ;;  %s539_s18 = smov 40   ;;  %s540_s19 = smov 72  }
   0x4   :  { %495 = vmatprep.subr.bf16.mxu0 %v531_v0  ;;  %510 = vmatprep.subr.bf16.mxu1 %v531_v0  ;;  %s541_s20 = smov 120   ;;  %s542_s21 = smov 112  }
   0x5   :  { %s543_s22 = smov 104  }
   0x7   :  { %496 = vmatpush3.bf16.msra.mxu0 %v527_v2  ;;  %512 = vmatpush3.bf16.msra.mxu1 %v527_v2 }
   0xa   :  { %498 = vmatmul.mubr.msk.bf16.vlgmr.msra.gmra.mxu0 %vm59_vm1, %v528_v3  ;;  %502 = vmatmul.mubr.msk.bf16.vlgmr.msra.gmra.mxu1 %vm59_vm1, %v529_v4 }
   0xb   :  { %505 = vmatprep.mubr.msk.bf16.mxu1 %vm532_vm0, %v531_v0 }
  0x12   :  { %506 = vmatmul.mubr.msk.bf16.gmra.mxu1 %vm59_vm1, %v530_v5 }
  0xca   :  { %v103_v7 = vpop.f32.mrf.mxu0  ;;  %v111_v8 = vpop.f32.mrf.mxu1 }
  0xcb   :  { %v104_v9 = vadd.f32 %v414_v6, %v103_v7  ;;  %v112_v10 = vadd.f32 %v414_v6, %v111_v8 }
  0xcc   :  { %v499_v11 = vpop.f32.mrf.mxu0  ;;  %v503_v12 = vpop.f32.mrf.mxu1 }
  0xcd   :  { %v125_v13 = vmul.f32 0.35355338, %v104_v9  ;;  %v483_v14 = vpack.c.bf16 %v104_v9, %v104_v9  ;;  %v127_v15 = vmul.f32 0.35355338, %v112_v10  ;;  %v485_v16 = vpack.c.bf16 %v112_v10, %v112_v10 }
  0xce   :  { %v106_v17 = vpop.f32.mrf.mxu0  ;;  %v114_v18 = vpop.f32.mrf.mxu1 }
  0xcf   :  { %v478_v19 = vpack.c.bf16 %v125_v13, %v125_v13  ;;  %v480_v20 = vpack.c.bf16 %v127_v15, %v127_v15  ;;  %v107_v21 = vadd.f32 %v414_v6, %v106_v17  ;;  %v115_v22 = vadd.f32 %v414_v6, %v114_v18  ;;  %177 = vrot.lane.b32.xlu1 %v485_v16, %s533_s0 }
  0xd0   :  { %173 = vrot.lane.b32.xlu0 %v483_v14, %s533_s0  ;;  %v500_v23 = vpop.f32.mrf.mxu0  ;;  %v504_v24 = vpop.f32.mrf.mxu1 }
  0xd1   :  { %152 = vst.msk [vmem:[%s899_s3] sm:$0xf] %vm151_vm2, %v478_v19  ;;  %154 = vst.msk [vmem:[%s899_s3 + $0x8] sm:$0xf] %vm151_vm2, %v480_v20  ;;  %v126_v25 = vmul.f32 0.35355338, %v107_v21  ;;  %v486_v36 = vpack.c.bf16 %v115_v22, %v115_v22  ;;  %v484_v37 = vpack.c.bf16 %v107_v21, %v107_v21 }
  0xd2   :  { %v128_v26 = vmul.f32 0.35355338, %v115_v22  ;;  %v119_v27 = vpop.f32.mrf.mxu1 }
  0xd3   :  { %v479_v28 = vpack.c.bf16 %v126_v25, %v126_v25  ;;  %193 = vrot.lane.b32.xlu1 %v483_v14, %s534_s7  ;;  %v120_v30 = vadd.f32 %v414_v6, %v119_v27 }
  0xd4   :  { %v605_v29 = vpack.c.bf16 %v128_v26, %v128_v26  ;;  %255 = vrot.lane.b32.xlu0 %v483_v14, %s535_s8  ;;  %v507_v31 = vpop.f32.mrf.mxu1 }
  0xd5   :  { %153 = vst.msk [vmem:[%s899_s3 + $0x4] sm:$0xf] %vm151_vm2, %v479_v28  ;;  %v129_v32 = vmul.f32 0.35355338, %v120_v30  ;;  %v487_v38 = vpack.c.bf16 %v120_v30, %v120_v30 }
  0xd6   :  { %155 = vst.msk [vmem:[%s899_s3 + $0xc] sm:$0xf] %vm151_vm2, %v605_v29  ;;  %v122_v33 = vpop.f32.mrf.mxu1 }
  0xd7   :  { %197 = vrot.lane.b32.xlu1 %v485_v16, %s534_s7  ;;  %v482_v34 = vpack.c.bf16 %v129_v32, %v129_v32 }
  0xd8   :  { %259 = vrot.lane.b32.xlu0 %v485_v16, %s535_s8  ;;  %v508_v35 = vpop.f32.mrf.mxu1 }
  0xd9   :  { %156 = vst.msk [vmem:[%s899_s3 + $0x10] sm:$0xf] %vm151_vm2, %v482_v34 }
  0xdb   :  { %234 = vrot.lane.b32.xlu1 %v483_v14, %s536_s15 }
  0xdc   :  { %297 = vrot.lane.b32.xlu0 %v483_v14, %s537_s16 }
  0xdf   :  { %238 = vrot.lane.b32.xlu1 %v485_v16, %s536_s15 }
  0xe0   :  { %301 = vrot.lane.b32.xlu0 %v485_v16, %s537_s16 }
  0xe3   :  { %318 = vrot.lane.b32.xlu1 %v483_v14, %s538_s17 }
  0xe4   :  { %381 = vrot.lane.b32.xlu0 %v483_v14, %s539_s18 }
  0xe7   :  { %322 = vrot.lane.b32.xlu1 %v485_v16, %s538_s17 }
  0xe8   :  { %385 = vrot.lane.b32.xlu0 %v485_v16, %s539_s18 }
  0xeb   :  { %360 = vrot.lane.b32.xlu1 %v483_v14, %s540_s19 }
  0xec   :  { %213 = vrot.lane.b32.xlu0 %v478_v19, %s541_s20 }
  0xef   :  { %364 = vrot.lane.b32.xlu1 %v485_v16, %s540_s19 }
  0xf0   :  { %217 = vrot.lane.b32.xlu0 %v480_v20, %s541_s20 }
  0xf3   :  { %276 = vrot.lane.b32.xlu1 %v478_v19, %s542_s21 }
  0xf4   :  { %339 = vrot.lane.b32.xlu0 %v478_v19, %s543_s22 }
  0xf7   :  { %280 = vrot.lane.b32.xlu1 %v480_v20, %s542_s21 }
  0xf8   :  { %343 = vrot.lane.b32.xlu0 %v480_v20, %s543_s22 }
  0xfb   :  { %179 = vrot.lane.b32.xlu1 %v486_v36, %s533_s0 }
  0xfc   :  { %175 = vrot.lane.b32.xlu0 %v484_v37, %s533_s0 }
  0xff   :  { %257 = vrot.lane.b32.xlu1 %v484_v37, %s535_s8 }
 0x100   :  { %195 = vrot.lane.b32.xlu0 %v484_v37, %s534_s7 }
 0x103   :  { %261 = vrot.lane.b32.xlu1 %v486_v36, %s535_s8 }
 0x104   :  { %199 = vrot.lane.b32.xlu0 %v486_v36, %s534_s7 }
 0x107   :  { %299 = vrot.lane.b32.xlu1 %v484_v37, %s537_s16 }
 0x108   :  { %236 = vrot.lane.b32.xlu0 %v484_v37, %s536_s15 }
 0x10b   :  { %303 = vrot.lane.b32.xlu1 %v486_v36, %s537_s16 }
 0x10c   :  { %240 = vrot.lane.b32.xlu0 %v486_v36, %s536_s15 }
 0x10f   :  { %383 = vrot.lane.b32.xlu1 %v484_v37, %s539_s18 }
 0x110   :  { %320 = vrot.lane.b32.xlu0 %v484_v37, %s538_s17 }
 0x113   :  { %215 = vrot.lane.b32.xlu1 %v479_v28, %s541_s20 }
 0x114   :  { %324 = vrot.lane.b32.xlu0 %v486_v36, %s538_s17 }
 0x117   :  { %219 = vrot.lane.b32.xlu1 %v605_v29, %s541_s20 }
 0x118   :  { %362 = vrot.lane.b32.xlu0 %v484_v37, %s540_s19 }
 0x11b   :  { %341 = vrot.lane.b32.xlu1 %v479_v28, %s543_s22 }
 0x11c   :  { %366 = vrot.lane.b32.xlu0 %v486_v36, %s540_s19 }
 0x11f   :  { %345 = vrot.lane.b32.xlu1 %v605_v29, %s543_s22 }
 0x120   :  { %278 = vrot.lane.b32.xlu0 %v479_v28, %s542_s21 }
 0x123   :  { %201 = vrot.lane.b32.xlu1 %v487_v38, %s534_s7 }
 0x124   :  { %282 = vrot.lane.b32.xlu0 %v605_v29, %s542_s21 }
 0x127   :  { %242 = vrot.lane.b32.xlu1 %v487_v38, %s536_s15 }
 0x128   :  { %181 = vrot.lane.b32.xlu0 %v487_v38, %s533_s0 }
 0x12b   :  { %326 = vrot.lane.b32.xlu1 %v487_v38, %s538_s17 }
 0x12c   :  { %263 = vrot.lane.b32.xlu0 %v487_v38, %s535_s8 }
 0x12f   :  { %368 = vrot.lane.b32.xlu1 %v487_v38, %s540_s19 }
 0x130   :  { %305 = vrot.lane.b32.xlu0 %v487_v38, %s537_s16 }
 0x133   :  { %284 = vrot.lane.b32.xlu1 %v482_v34, %s542_s21 }
 0x134   :  { %221 = vrot.lane.b32.xlu0 %v482_v34, %s541_s20 }
 0x137   :  { %387 = vrot.lane.b32.xlu1 %v486_v36, %s539_s18 }
 0x138   :  { %347 = vrot.lane.b32.xlu0 %v482_v34, %s543_s22 }
 0x13c   :  { %389 = vrot.lane.b32.xlu0 %v487_v38, %s539_s18 }
 0x141   :  { %v178_v39 = vpop.permute.xlu1 %177 }
 0x142   :  { %190 = vst.msk [vmem:[%s900_s4 + $0x8] sm:$0xf] %vm151_vm2, %v178_v39  ;;  %v174_v40 = vpop.permute.xlu0 %173 }
 0x143   :  { %188 = vst.msk [vmem:[%s900_s4] sm:$0xf] %vm151_vm2, %v174_v40 }
 0x145   :  { %v194_v41 = vpop.permute.xlu1 %193 }
 0x146   :  { %208 = vst.msk [vmem:[%s901_s5] sm:$0xf] %vm151_vm2, %v194_v41  ;;  %v256_v42 = vpop.permute.xlu0 %255 }
 0x147   :  { %443 = vst.msk [vmem:[%s901_s5 + $0x14] sm:$0xf] %vm151_vm2, %v256_v42 }
 0x149   :  { %v198_v43 = vpop.permute.xlu1 %197 }
 0x14a   :  { %210 = vst.msk [vmem:[%s901_s5 + $0x8] sm:$0xf] %vm151_vm2, %v198_v43  ;;  %v260_v44 = vpop.permute.xlu0 %259 }
 0x14b   :  { %445 = vst.msk [vmem:[%s901_s5 + $0x1c] sm:$0xf] %vm151_vm2, %v260_v44 }
 0x14d   :  { %v235_v45 = vpop.permute.xlu1 %234 }
 0x14e   :  { %438 = vst.msk [vmem:[%s900_s4 + $0x14] sm:$0xf] %vm151_vm2, %v235_v45  ;;  %v298_v46 = vpop.permute.xlu0 %297 }
 0x14f   :  { %453 = vst.msk [vmem:[%s900_s4 + $0x28] sm:$0xf] %vm151_vm2, %v298_v46 }
 0x151   :  { %v239_v47 = vpop.permute.xlu1 %238 }
 0x152   :  { %440 = vst.msk [vmem:[%s900_s4 + $0x1c] sm:$0xf] %vm151_vm2, %v239_v47  ;;  %v302_v48 = vpop.permute.xlu0 %301 }
 0x153   :  { %455 = vst.msk [vmem:[%s900_s4 + $0x30] sm:$0xf] %vm151_vm2, %v302_v48 }
 0x155   :  { %v319_v49 = vpop.permute.xlu1 %318 }
 0x156   :  { %458 = vst.msk [vmem:[%s901_s5 + $0x28] sm:$0xf] %vm151_vm2, %v319_v49  ;;  %v382_v50 = vpop.permute.xlu0 %381 }
 0x157   :  { %473 = vst.msk [vmem:[%s901_s5 + $0x3c] sm:$0xf] %vm151_vm2, %v382_v50 }
 0x159   :  { %v323_v51 = vpop.permute.xlu1 %322 }
 0x15a   :  { %460 = vst.msk [vmem:[%s901_s5 + $0x30] sm:$0xf] %vm151_vm2, %v323_v51  ;;  %v386_v52 = vpop.permute.xlu0 %385 }
 0x15b   :  { %475 = vst.msk [vmem:[%s901_s5 + $0x44] sm:$0xf] %vm151_vm2, %v386_v52 }
 0x15d   :  { %v361_v53 = vpop.permute.xlu1 %360 }
 0x15e   :  { %468 = vst.msk [vmem:[%s900_s4 + $0x3c] sm:$0xf] %vm151_vm2, %v361_v53  ;;  %v214_v54 = vpop.permute.xlu0 %213 }
 0x15f   :  { %433 = vst.msk [vmem:[%s899_s3 + $0x14] sm:$0xf] %vm151_vm2, %v214_v54 }
 0x161   :  { %v365_v55 = vpop.permute.xlu1 %364 }
 0x162   :  { %470 = vst.msk [vmem:[%s900_s4 + $0x44] sm:$0xf] %vm151_vm2, %v365_v55  ;;  %v218_v56 = vpop.permute.xlu0 %217 }
 0x163   :  { %435 = vst.msk [vmem:[%s899_s3 + $0x1c] sm:$0xf] %vm151_vm2, %v218_v56 }
 0x165   :  { %v277_v57 = vpop.permute.xlu1 %276 }
 0x166   :  { %448 = vst.msk [vmem:[%s899_s3 + $0x28] sm:$0xf] %vm151_vm2, %v277_v57  ;;  %v340_v58 = vpop.permute.xlu0 %339 }
 0x167   :  { %463 = vst.msk [vmem:[%s899_s3 + $0x3c] sm:$0xf] %vm151_vm2, %v340_v58 }
 0x169   :  { %v281_v59 = vpop.permute.xlu1 %280 }
 0x16a   :  { %450 = vst.msk [vmem:[%s899_s3 + $0x30] sm:$0xf] %vm151_vm2, %v281_v59  ;;  %v344_v60 = vpop.permute.xlu0 %343 }
 0x16b   :  { %465 = vst.msk [vmem:[%s899_s3 + $0x44] sm:$0xf] %vm151_vm2, %v344_v60 }
 0x16d   :  { %v180_v61 = vpop.permute.xlu1 %179 }
 0x16e   :  { %191 = vst.msk [vmem:[%s900_s4 + $0xc] sm:$0xf] %vm151_vm2, %v180_v61  ;;  %v176_v62 = vpop.permute.xlu0 %175 }
 0x16f   :  { %189 = vst.msk [vmem:[%s900_s4 + $0x4] sm:$0xf] %vm151_vm2, %v176_v62 }
 0x171   :  { %v258_v63 = vpop.permute.xlu1 %257 }
 0x172   :  { %444 = vst.msk [vmem:[%s901_s5 + $0x18] sm:$0xf] %vm151_vm2, %v258_v63  ;;  %v196_v0 = vpop.permute.xlu0 %195 }
 0x173   :  { %209 = vst.msk [vmem:[%s901_s5 + $0x4] sm:$0xf] %vm151_vm2, %v196_v0 }
 0x175   :  { %v262_v1 = vpop.permute.xlu1 %261 }
 0x176   :  { %446 = vst.msk [vmem:[%s901_s5 + $0x20] sm:$0xf] %vm151_vm2, %v262_v1  ;;  %v200_v2 = vpop.permute.xlu0 %199 }
 0x177   :  { %211 = vst.msk [vmem:[%s901_s5 + $0xc] sm:$0xf] %vm151_vm2, %v200_v2 }
 0x179   :  { %v300_v3 = vpop.permute.xlu1 %299 }
 0x17a   :  { %454 = vst.msk [vmem:[%s900_s4 + $0x2c] sm:$0xf] %vm151_vm2, %v300_v3  ;;  %v237_v4 = vpop.permute.xlu0 %236 }
 0x17b   :  { %439 = vst.msk [vmem:[%s900_s4 + $0x18] sm:$0xf] %vm151_vm2, %v237_v4 }
 0x17d   :  { %v304_v5 = vpop.permute.xlu1 %303 }
 0x17e   :  { %456 = vst.msk [vmem:[%s900_s4 + $0x34] sm:$0xf] %vm151_vm2, %v304_v5  ;;  %v241_v6 = vpop.permute.xlu0 %240 }
 0x17f   :  { %441 = vst.msk [vmem:[%s900_s4 + $0x20] sm:$0xf] %vm151_vm2, %v241_v6 }
 0x181   :  { %v384_v7 = vpop.permute.xlu1 %383 }
 0x182   :  { %474 = vst.msk [vmem:[%s901_s5 + $0x40] sm:$0xf] %vm151_vm2, %v384_v7  ;;  %v321_v8 = vpop.permute.xlu0 %320 }
 0x183   :  { %459 = vst.msk [vmem:[%s901_s5 + $0x2c] sm:$0xf] %vm151_vm2, %v321_v8 }
 0x185   :  { %v216_v9 = vpop.permute.xlu1 %215 }
 0x186   :  { %v325_v10 = vpop.permute.xlu0 %324  ;;  %434 = vst.msk [vmem:[%s899_s3 + $0x18] sm:$0xf] %vm151_vm2, %v216_v9 }
 0x187   :  { %461 = vst.msk [vmem:[%s901_s5 + $0x34] sm:$0xf] %vm151_vm2, %v325_v10 }
 0x189   :  { %v220_v11 = vpop.permute.xlu1 %219 }
 0x18a   :  { %v363_v12 = vpop.permute.xlu0 %362  ;;  %436 = vst.msk [vmem:[%s899_s3 + $0x20] sm:$0xf] %vm151_vm2, %v220_v11 }
 0x18b   :  { %469 = vst.msk [vmem:[%s900_s4 + $0x40] sm:$0xf] %vm151_vm2, %v363_v12 }
 0x18d   :  { %v342_v13 = vpop.permute.xlu1 %341 }
 0x18e   :  { %v367_v14 = vpop.permute.xlu0 %366  ;;  %464 = vst.msk [vmem:[%s899_s3 + $0x40] sm:$0xf] %vm151_vm2, %v342_v13 }
 0x18f   :  { %471 = vst.msk [vmem:[%s900_s4 + $0x48] sm:$0xf] %vm151_vm2, %v367_v14 }
 0x191   :  { %v346_v15 = vpop.permute.xlu1 %345 }
 0x192   :  { %v279_v16 = vpop.permute.xlu0 %278  ;;  %466 = vst.msk [vmem:[%s899_s3 + $0x48] sm:$0xf] %vm151_vm2, %v346_v15 }
 0x193   :  { %449 = vst.msk [vmem:[%s899_s3 + $0x2c] sm:$0xf] %vm151_vm2, %v279_v16 }
 0x195   :  { %v202_v17 = vpop.permute.xlu1 %201 }
 0x196   :  { %v283_v18 = vpop.permute.xlu0 %282  ;;  %212 = vst.msk [vmem:[%s901_s5 + $0x10] sm:$0xf] %vm151_vm2, %v202_v17 }
 0x197   :  { %451 = vst.msk [vmem:[%s899_s3 + $0x34] sm:$0xf] %vm151_vm2, %v283_v18 }
 0x199   :  { %v243_v19 = vpop.permute.xlu1 %242 }
 0x19a   :  { %v182_v20 = vpop.permute.xlu0 %181  ;;  %442 = vst.msk [vmem:[%s900_s4 + $0x24] sm:$0xf] %vm151_vm2, %v243_v19 }
 0x19b   :  { %192 = vst.msk [vmem:[%s900_s4 + $0x10] sm:$0xf] %vm151_vm2, %v182_v20 }
 0x19d   :  { %v327_v21 = vpop.permute.xlu1 %326 }
 0x19e   :  { %v264_v22 = vpop.permute.xlu0 %263  ;;  %462 = vst.msk [vmem:[%s901_s5 + $0x38] sm:$0xf] %vm151_vm2, %v327_v21 }
 0x19f   :  { %447 = vst.msk [vmem:[%s901_s5 + $0x24] sm:$0xf] %vm151_vm2, %v264_v22 }
 0x1a1   :  { %v369_v23 = vpop.permute.xlu1 %368 }
 0x1a2   :  { %v306_v24 = vpop.permute.xlu0 %305  ;;  %472 = vst.msk [vmem:[%s900_s4 + $0x4c] sm:$0xf] %vm151_vm2, %v369_v23 }
 0x1a3   :  { %457 = vst.msk [vmem:[%s900_s4 + $0x38] sm:$0xf] %vm151_vm2, %v306_v24 }
 0x1a5   :  { %v285_v25 = vpop.permute.xlu1 %284 }
 0x1a6   :  { %v222_v26 = vpop.permute.xlu0 %221  ;;  %452 = vst.msk [vmem:[%s899_s3 + $0x38] sm:$0xf] %vm151_vm2, %v285_v25 }
 0x1a7   :  { %437 = vst.msk [vmem:[%s899_s3 + $0x24] sm:$0xf] %vm151_vm2, %v222_v26 }
 0x1a9   :  { %v388_v27 = vpop.permute.xlu1 %387 }
 0x1aa   :  { %v348_v28 = vpop.permute.xlu0 %347  ;;  %476 = vst.msk [vmem:[%s901_s5 + $0x48] sm:$0xf] %vm151_vm2, %v388_v27 }
 0x1ab   :  { %467 = vst.msk [vmem:[%s899_s3 + $0x4c] sm:$0xf] %vm151_vm2, %v348_v28 }
 0x1ae   :  { %v390_v29 = vpop.permute.xlu0 %389 }
 0x1af   :  { %477 = vst.msk [vmem:[%s901_s5 + $0x4c] sm:$0xf] %vm151_vm2, %v390_v29 }

</bundles_post_ra>
